<compile_context>
chip_gen: v7x
topology: tpu7x:2x2x1
jax: 0.10.0
libtpu: 0.0.40
codegen_flags: <defaults>
</compile_context>

<pallas_src>
import math
from math import factorial

import numpy as np
import jax
import jax.numpy as jnp
from jax import lax
from jax.experimental import pallas as pl
from jax.experimental.pallas import tpu as pltpu


# ----------------------------------------------------------------------------
# Deterministic real-SO(3) Clebsch-Gordan coefficients (e3nn _so3_clebsch_gordan)
# ----------------------------------------------------------------------------
def _su2_cg(j1, j2, j3):
    def f(n):
        assert n == round(n)
        return float(factorial(round(n)))

    mat = np.zeros((2 * j1 + 1, 2 * j2 + 1, 2 * j3 + 1), dtype=np.float64)
    for m1 in range(-j1, j1 + 1):
        for m2 in range(-j2, j2 + 1):
            m3 = m1 + m2
            if abs(m3) > j3:
                continue
            vmin = int(max(-j1 + j2 + m3, -j1 + m1, 0))
            vmax = int(min(j2 + j3 + m1, j3 - j1 + j2, j3 + m3))
            C = ((2.0 * j3 + 1.0)
                 * f(j3 + j1 - j2) * f(j3 - j1 + j2) * f(j1 + j2 - j3)
                 * f(j3 + m3) * f(j3 - m3)
                 / (f(j1 + j2 + j3 + 1) * f(j1 - m1) * f(j1 + m1)
                    * f(j2 - m2) * f(j2 + m2))) ** 0.5
            S = 0.0
            for v in range(vmin, vmax + 1):
                S += ((-1.0) ** (v + j2 + m2)
                      * f(j2 + j3 + m1 - v) * f(j1 - m1 + v)
                      / (f(v) * f(j3 - j1 + j2 - v) * f(j3 + m3 - v)
                         * f(v + j1 - j2 - m3)))
            mat[j1 + m1, j2 + m2, j3 + m3] = C * S
    return mat


def _change_basis_real_to_complex(l):
    q = np.zeros((2 * l + 1, 2 * l + 1), dtype=np.complex128)
    for m in range(-l, 0):
        q[l + m, l + abs(m)] = 1.0 / math.sqrt(2)
        q[l + m, l - abs(m)] = -1j / math.sqrt(2)
    q[l, l] = 1.0
    for m in range(1, l + 1):
        q[l + m, l + abs(m)] = (-1) ** m / math.sqrt(2)
        q[l + m, l - abs(m)] = 1j * (-1) ** m / math.sqrt(2)
    return (-1j) ** l * q


def so3_clebsch_gordan(l1, l2, l3):
    Q1 = _change_basis_real_to_complex(l1)
    Q2 = _change_basis_real_to_complex(l2)
    Q3 = _change_basis_real_to_complex(l3)
    C = _su2_cg(l1, l2, l3).astype(np.complex128)
    C = np.einsum("ij,kl,mn,ikn->jlm", Q1, Q2, np.conj(Q3.T), C)
    assert np.all(np.abs(C.imag) < 1e-8)
    C = C.real
    n = np.linalg.norm(C)
    if n > 0:
        C = C / n
    return C.astype(np.float32)


def validate_triangle_inequality(l1, l2, l3):
    return abs(l1 - l2) <= l3 <= l1 + l2


# ----------------------------------------------------------------------------
# Parameter construction (deterministic, mirrors MultiCGLayer.__init__)
# ----------------------------------------------------------------------------
def build_multi_cg_params(key, max_sh_degree, base_l_values, multiplicity,
                          num_cg_layers, num_sh_feats):
    """Fold per-combo scalar weights * CG blocks into one (S, D, D) tensor/layer."""
    D = sum(multiplicity * (2 * l + 1) for l in base_l_values)
    S = (max_sh_degree + 1) ** 2
    irrep_offsets = []
    off = 0
    for l in base_l_values:
        irrep_offsets.append(off)
        off += multiplicity * (2 * l + 1)

    layer_Ts = []
    for _layer_idx in range(num_cg_layers):
        T = np.zeros((S, D, D), dtype=np.float32)
        for d in range(max_sh_degree + 1):
            for ni, nl in enumerate(base_l_values):
                for oi, ol in enumerate(base_l_values):
                    if not validate_triangle_inequality(d, nl, ol):
                        continue
                    cg = so3_clebsch_gordan(d, nl, ol)
                    if np.abs(cg).sum() <= 1e-10:
                        continue
                    for ic in range(multiplicity):
                        for oc in range(multiplicity):
                            key, sub = jax.random.split(key)
                            w = 0.1 * float(jax.random.normal(sub, ()))
                            if d >= num_sh_feats:
                                continue  # combo skipped at forward time
                            in_off = irrep_offsets[ni] + ic * (2 * nl + 1)
                            out_off = irrep_offsets[oi] + oc * (2 * ol + 1)
                            T[d * d:d * d + 2 * d + 1,
                              in_off:in_off + 2 * nl + 1,
                              out_off:out_off + 2 * ol + 1] += w * cg
        layer_Ts.append(jnp.asarray(T))
    return layer_Ts, D, S


# ----------------------------------------------------------------------------
# Host-side folding / padding helpers
# ----------------------------------------------------------------------------
def _round_up(x, m):
    return ((x + m - 1) // m) * m


def _pack_folded_T(layer_Ts, D, S, D_pad, S_pad):
    """Stack + pad per-layer (S, D, D) tensors to (L, S_pad*D_pad, D_pad)."""
    L = len(layer_Ts)
    K = S_pad * D_pad
    T_all = np.zeros((L, K, D_pad), np.float32)
    for li, T in enumerate(layer_Ts):
        Tn = np.asarray(T, dtype=np.float32)  # (S, D, D)
        for s in range(S):
            T_all[li, s * D_pad:s * D_pad + D, :D] = Tn[s]
    return jnp.asarray(T_all)


def _expand_matrix(S_pad, D_pad):
    """(S_pad, S_pad*D_pad) matrix with expand[s, s*D_pad:(s+1)*D_pad] = 1.

    sh @ expand broadcasts each SH coefficient across its D_pad-lane block,
    giving the Khatri-Rao operand without any in-kernel relayout/reshape.
    """
    m = np.zeros((S_pad, S_pad * D_pad), np.float32)
    for s in range(S_pad):
        m[s, s * D_pad:(s + 1) * D_pad] = 1.0
    return jnp.asarray(m)


# ----------------------------------------------------------------------------
# Fused multi-layer CG kernel
# ----------------------------------------------------------------------------
def _multi_cg_kernel(src_ref, tgt_ref,              # scalar-prefetch (SMEM, int32)
                     sh_ref, x0_ref, t_ref, exp_ref,  # VMEM inputs
                     o_ref,                           # VMEM output
                     x_cur, acc, x_src, msg_s):       # VMEM scratch
    l = pl.program_id(0)
    e = pl.program_id(1)
    n_l = pl.num_programs(0)
    n_e = pl.num_programs(1)

    TE, S_pad = sh_ref.shape

    # --- first grid step: load initial node features into the resident buffer
    @pl.when(jnp.logical_and(l == 0, e == 0))
    def _():
        x_cur[...] = x0_ref[...]

    # --- start of every layer: zero the scatter accumulator
    @pl.when(e == 0)
    def _():
        acc[...] = jnp.zeros_like(acc)

    e_base = e * TE

    # --- gather: x_src[j] = x_cur[src[e_base + j]]   (O(TE * D_pad) row copies)
    def gather_body(j, carry):
        n = src_ref[e_base + j]
        x_src[pl.ds(j, 1), :] = x_cur[pl.ds(n, 1), :]
        return carry

    lax.fori_loop(0, TE, gather_body, 0)

    # --- CG contraction: ONE lane-dense MXU matmul via the Khatri-Rao product
    sh = sh_ref[...]                                                  # (TE, S_pad)
    xs = x_src[...]                                                   # (TE, D_pad)
    sh_exp = jnp.dot(sh, exp_ref[...],
                     preferred_element_type=jnp.float32)              # (TE, S_pad*D_pad)
    xs_rep = jnp.concatenate([xs] * S_pad, axis=1)                    # (TE, S_pad*D_pad)
    kr = sh_exp * xs_rep                              # kr[e, s*D+i] = sh[e,s] * x_src[e,i]
    msg_s[...] = jnp.dot(kr, t_ref[0],
                         preferred_element_type=jnp.float32)          # (TE, D_pad)

    # --- scatter-add: acc[tgt[e_base + j]] += msg[j]  (O(TE * D_pad) row RMW)
    def scatter_body(j, carry):
        n = tgt_ref[e_base + j]
        acc[pl.ds(n, 1), :] = acc[pl.ds(n, 1), :] + msg_s[pl.ds(j, 1), :]
        return carry

    lax.fori_loop(0, TE, scatter_body, 0)

    # --- end of layer: accumulated output becomes next layer's input
    @pl.when(e == n_e - 1)
    def _():
        x_cur[...] = acc[...]

    # --- very last step: write the (padded) result out
    @pl.when(jnp.logical_and(l == n_l - 1, e == n_e - 1))
    def _():
        o_ref[...] = acc[...]


def multi_cg_forward(node_irreps, edge_index, sh_edge_features, layer_Ts,
                     *, edge_tile=None):
    """Pallas forward mirroring MultiCGLayer.forward (all CG layers fused)."""
    N, D = node_irreps.shape
    E = edge_index.shape[1]
    if E == 0:
        return node_irreps
    L = len(layer_Ts)
    S = sum(int(f.shape[1]) for f in sh_edge_features)

    D_pad = _round_up(D, 128)          # lane-dense feature dim
    S_pad = _round_up(max(S, 1), 8)    # sublane-friendly SH dim
    K = S_pad * D_pad                  # Khatri-Rao contraction dim

    if edge_tile is None:
        edge_tile = min(256, _round_up(E, 8))
    TE = max(8, _round_up(edge_tile, 8))
    E_pad = _round_up(E, TE)

    # --- host-side parameter fold / padding ---
    T_all = _pack_folded_T(layer_Ts, D, S, D_pad, S_pad)     # (L, K, D_pad)
    expand = _expand_matrix(S_pad, D_pad)                    # (S_pad, K)

    sh_all = jnp.concatenate(
        [f.astype(jnp.float32) for f in sh_edge_features], axis=1)      # (E, S)
    sh_pad = jnp.zeros((E_pad, S_pad), jnp.float32).at[:E, :S].set(sh_all)
    src = jnp.zeros((E_pad,), jnp.int32).at[:E].set(edge_index[0].astype(jnp.int32))
    tgt = jnp.zeros((E_pad,), jnp.int32).at[:E].set(edge_index[1].astype(jnp.int32))
    x0 = jnp.zeros((N, D_pad), jnp.float32).at[:, :D].set(
        node_irreps.astype(jnp.float32))

    grid = (L, E_pad // TE)

    # rough VMEM need (pipelined inputs + resident scratch), with headroom
    vmem_bytes = 4 * (2 * TE * S_pad + 2 * K * D_pad + S_pad * K
                      + 2 * N * D_pad          # x0 + out
                      + 2 * N * D_pad          # x_cur + acc scratch
                      + 2 * TE * D_pad)        # x_src + msg scratch
    vmem_limit = int(min(48 * 2**20, max(16 * 2**20, 2 * vmem_bytes)))

    out = pl.pallas_call(
        _multi_cg_kernel,
        out_shape=jax.ShapeDtypeStruct((N, D_pad), jnp.float32),
        grid_spec=pltpu.PrefetchScalarGridSpec(
            num_scalar_prefetch=2,           # src, tgt -> SMEM
            grid=grid,
            in_specs=[
                pl.BlockSpec((TE, S_pad), lambda l, e, *_: (e, 0)),       # SH tile
                pl.BlockSpec((N, D_pad), lambda l, e, *_: (0, 0)),        # x0 (once)
                pl.BlockSpec((1, K, D_pad), lambda l, e, *_: (l, 0, 0)),  # folded CG*w
                pl.BlockSpec((S_pad, K), lambda l, e, *_: (0, 0)),        # expand (once)
            ],
            out_specs=pl.BlockSpec((N, D_pad), lambda l, e, *_: (0, 0)),
            scratch_shapes=[
                pltpu.VMEM((N, D_pad), jnp.float32),    # resident node features
                pltpu.VMEM((N, D_pad), jnp.float32),    # per-layer scatter accumulator
                pltpu.VMEM((TE, D_pad), jnp.float32),   # gathered source features
                pltpu.VMEM((TE, D_pad), jnp.float32),   # per-tile messages
            ],
        ),
        compiler_params=pltpu.CompilerParams(
            dimension_semantics=("arbitrary", "arbitrary"),
            vmem_limit_bytes=vmem_limit,
        ),
    )(src, tgt, sh_pad, x0, T_all, expand)

    return out[:, :D]


# ----------------------------------------------------------------------------
# Pure-JAX reference (same math, no Pallas) for a sanity check
# ----------------------------------------------------------------------------
def multi_cg_reference(node_irreps, edge_index, sh_edge_features, layer_Ts):
    num_nodes = node_irreps.shape[0]
    src = edge_index[0]
    tgt = edge_index[1]
    sh_all = jnp.concatenate(sh_edge_features, axis=1).astype(jnp.float32)
    x = node_irreps.astype(jnp.float32)
    for T in layer_Ts:
        msg = jnp.einsum("es,ei,sio->eo", sh_all, x[src], T)
        x = jax.ops.segment_sum(msg, tgt, num_segments=num_nodes)
    return x


if __name__ == "__main__":
    # Module hyperparameters (small, consistent with the PyTorch module)
    max_sh_degree = 1
    base_l_values = [0, 1]
    multiplicity = 2
    num_cg_layers = 2

    num_nodes = 8
    num_edges = 16

    key = jax.random.PRNGKey(0)
    k_w, k_x, k_e, k_sh0, k_sh1 = jax.random.split(key, 5)

    num_sh_feats = max_sh_degree + 1
    layer_Ts, D, S = build_multi_cg_params(
        k_w, max_sh_degree, base_l_values, multiplicity, num_cg_layers,
        num_sh_feats)

    node_irreps = jax.random.normal(k_x, (num_nodes, D), dtype=jnp.float32)
    edge_index = jax.random.randint(k_e, (2, num_edges), 0, num_nodes,
                                    dtype=jnp.int32)
    sh_edge_features = [
        jax.random.normal(k_sh0, (num_edges, 1), dtype=jnp.float32),   # l=0
        jax.random.normal(k_sh1, (num_edges, 3), dtype=jnp.float32),   # l=1
    ]

    # edge_tile=8 -> 2 edge steps per layer: exercises the accumulation path
    out = multi_cg_forward(node_irreps, edge_index, sh_edge_features, layer_Ts,
                           edge_tile=8)
    out = jax.block_until_ready(out)

    ref = multi_cg_reference(node_irreps, edge_index, sh_edge_features, layer_Ts)
    ref = jax.block_until_ready(ref)

    max_err = float(jnp.max(jnp.abs(out - ref)))
    assert out.shape == (num_nodes, D), out.shape
    assert max_err < 2e-3, f"mismatch vs reference: {max_err}"

    print("KERNEL_OK")
</pallas_src>

<mosaic_0001>
module attributes {stable_mosaic.version = 11 : i64} {
  func.func @_multi_cg_kernel(%arg0: i32, %arg1: i32, %arg2: memref<16xi32, #tpu.memory_space<smem>>, %arg3: memref<16xi32, #tpu.memory_space<smem>>, %arg4: memref<8x8xf32, #tpu.memory_space<vmem>>, %arg5: memref<8x128xf32, #tpu.memory_space<vmem>>, %arg6: memref<1x1024x128xf32, #tpu.memory_space<vmem>>, %arg7: memref<8x1024xf32, #tpu.memory_space<vmem>>, %arg8: memref<8x128xf32, #tpu.memory_space<vmem>>, %arg9: memref<8x128xf32, #tpu.memory_space<vmem>>, %arg10: memref<8x128xf32, #tpu.memory_space<vmem>>, %arg11: memref<8x128xf32, #tpu.memory_space<vmem>>, %arg12: memref<8x128xf32, #tpu.memory_space<vmem>>) attributes {dimension_semantics = [#tpu.dimension_semantics<arbitrary>, #tpu.dimension_semantics<arbitrary>], iteration_bounds = array<i64: 2, 2>, scalar_prefetch = 2 : i64, scratch_operands = 4 : i64, tpu.core_type = #tpu.core_type<tc>, window_params = [{transform_indices = @transform_0, window_bounds = array<i64: 8, 8>}, {pipeline_mode = #tpu.pipeline_mode<synchronous>, transform_indices = @transform_1, window_bounds = array<i64: 8, 128>}, {transform_indices = @transform_2, window_bounds = array<i64: 1, 1024, 128>}, {pipeline_mode = #tpu.pipeline_mode<synchronous>, transform_indices = @transform_3, window_bounds = array<i64: 8, 1024>}, {pipeline_mode = #tpu.pipeline_mode<synchronous>, transform_indices = @transform_4, window_bounds = array<i64: 8, 128>}]} {
    %c0_i32 = arith.constant 0 : i32
    %0 = arith.cmpi eq, %arg0, %c0_i32 : i32
    %c0_i32_0 = arith.constant 0 : i32
    %1 = arith.cmpi eq, %arg1, %c0_i32_0 : i32
    %2 = arith.andi %0, %1 : i1
    %3 = arith.extui %2 : i1 to i32
    %c0_i32_1 = arith.constant 0 : i32
    %4 = arith.cmpi ne, %3, %c0_i32_1 : i32
    scf.if %4 {
      %c0_27 = arith.constant 0 : index
      %c0_28 = arith.constant 0 : index
      %29 = vector.load %arg5[%c0_27, %c0_28] : memref<8x128xf32, #tpu.memory_space<vmem>>, vector<8x128xf32>
      %c0_29 = arith.constant 0 : index
      %c0_30 = arith.constant 0 : index
      %30 = vector.load %arg9[%c0_29, %c0_30] : memref<8x128xf32, #tpu.memory_space<vmem>>, vector<8x128xf32>
      tpu.vector_store %arg9[%c0_29, %c0_30], %29 {strides = array<i32>} : memref<8x128xf32, #tpu.memory_space<vmem>>, vector<8x128xf32>,
    } else {
    }
    %c0_i32_2 = arith.constant 0 : i32
    %5 = arith.cmpi eq, %arg1, %c0_i32_2 : i32
    %6 = arith.extui %5 : i1 to i32
    %c0_i32_3 = arith.constant 0 : i32
    %7 = arith.cmpi ne, %6, %c0_i32_3 : i32
    scf.if %7 {
      %cst_27 = arith.constant 0.000000e+00 : f32
      %29 = vector.broadcast %cst_27 : f32 to vector<8x128xf32>
      %c0_28 = arith.constant 0 : index
      %c0_29 = arith.constant 0 : index
      %30 = vector.load %arg10[%c0_28, %c0_29] : memref<8x128xf32, #tpu.memory_space<vmem>>, vector<8x128xf32>
      tpu.vector_store %arg10[%c0_28, %c0_29], %29 {strides = array<i32>} : memref<8x128xf32, #tpu.memory_space<vmem>>, vector<8x128xf32>,
    } else {
    }
    %c8_i32 = arith.constant 8 : i32
    %8 = arith.muli %arg1, %c8_i32 : i32
    %c0_i32_4 = arith.constant 0 : i32
    %c8_i32_5 = arith.constant 8 : i32
    %9 = arith.addi %c0_i32_4, %c8_i32_5 : i32
    %c1_i32 = arith.constant 1 : i32
    scf.for %arg13 = %c0_i32_4 to %9 step %c1_i32  : i32 {
      %29 = arith.addi %8, %arg13 : i32
      %30 = arith.index_cast %29 : i32 to index
      %31 = memref.load %arg2[%30] : memref<16xi32, #tpu.memory_space<smem>>
      %32 = arith.index_cast %31 : i32 to index
      %c0_27 = arith.constant 0 : index
      %33 = vector.load %arg9[%32, %c0_27] : memref<8x128xf32, #tpu.memory_space<vmem>>, vector<1x128xf32>
      %34 = arith.index_cast %arg13 : i32 to index
      %c0_28 = arith.constant 0 : index
      %35 = vector.load %arg11[%34, %c0_28] : memref<8x128xf32, #tpu.memory_space<vmem>>, vector<1x128xf32>
      tpu.vector_store %arg11[%34, %c0_28], %33 {strides = array<i32>} : memref<8x128xf32, #tpu.memory_space<vmem>>, vector<1x128xf32>,
    }
    %c8_i32_6 = arith.constant 8 : i32
    %c0 = arith.constant 0 : index
    %c0_7 = arith.constant 0 : index
    %10 = vector.load %arg4[%c0, %c0_7] : memref<8x8xf32, #tpu.memory_space<vmem>>, vector<8x8xf32>
    %c0_8 = arith.constant 0 : index
    %c0_9 = arith.constant 0 : index
    %11 = vector.load %arg11[%c0_8, %c0_9] : memref<8x128xf32, #tpu.memory_space<vmem>>, vector<8x128xf32>
    %c0_10 = arith.constant 0 : index
    %c0_11 = arith.constant 0 : index
    %12 = vector.load %arg7[%c0_10, %c0_11] : memref<8x1024xf32, #tpu.memory_space<vmem>>, vector<8x1024xf32>
    %cst = arith.constant dense<0.000000e+00> : vector<8x1024xf32>
    %13 = tpu.matmul %10, %12, %cst {dimension_numbers = #tpu.dot_dimension_numbers<[1], [0], [0], [1], [0, 0, 1, 1], [], []>} : vector<8x8xf32>, vector<8x1024xf32>, vector<8x1024xf32> -> vector<8x1024xf32>
    %14 = tpu.concatenate %11, %11, %11, %11, %11, %11, %11, %11 in 1 : vector<8x128xf32>, vector<8x128xf32>, vector<8x128xf32>, vector<8x128xf32>, vector<8x128xf32>, vector<8x128xf32>, vector<8x128xf32>, vector<8x128xf32> -> vector<8x1024xf32>
    %15 = arith.mulf %13, %14 : vector<8x1024xf32>
    %c0_12 = arith.constant 0 : index
    %c0_13 = arith.constant 0 : index
    %c0_14 = arith.constant 0 : index
    %16 = vector.load %arg6[%c0_12, %c0_13, %c0_14] : memref<1x1024x128xf32, #tpu.memory_space<vmem>>, vector<1x1024x128xf32>
    %17 = vector.shape_cast %16 : vector<1x1024x128xf32> to vector<1024x128xf32>
    %cst_15 = arith.constant dense<0.000000e+00> : vector<8x128xf32>
    %18 = tpu.matmul %15, %17, %cst_15 {dimension_numbers = #tpu.dot_dimension_numbers<[1], [0], [0], [1], [0, 0, 1, 1], [], []>} : vector<8x1024xf32>, vector<1024x128xf32>, vector<8x128xf32> -> vector<8x128xf32>
    %c0_16 = arith.constant 0 : index
    %c0_17 = arith.constant 0 : index
    %19 = vector.load %arg12[%c0_16, %c0_17] : memref<8x128xf32, #tpu.memory_space<vmem>>, vector<8x128xf32>
    tpu.vector_store %arg12[%c0_16, %c0_17], %18 {strides = array<i32>} : memref<8x128xf32, #tpu.memory_space<vmem>>, vector<8x128xf32>,
    %c0_i32_18 = arith.constant 0 : i32
    %c8_i32_19 = arith.constant 8 : i32
    %20 = arith.addi %c0_i32_18, %c8_i32_19 : i32
    %c1_i32_20 = arith.constant 1 : i32
    scf.for %arg13 = %c0_i32_18 to %20 step %c1_i32_20  : i32 {
      %29 = arith.addi %8, %arg13 : i32
      %30 = arith.index_cast %29 : i32 to index
      %31 = memref.load %arg3[%30] : memref<16xi32, #tpu.memory_space<smem>>
      %32 = arith.index_cast %31 : i32 to index
      %c0_27 = arith.constant 0 : index
      %33 = vector.load %arg10[%32, %c0_27] : memref<8x128xf32, #tpu.memory_space<vmem>>, vector<1x128xf32>
      %34 = arith.index_cast %arg13 : i32 to index
      %c0_28 = arith.constant 0 : index
      %35 = vector.load %arg12[%34, %c0_28] : memref<8x128xf32, #tpu.memory_space<vmem>>, vector<1x128xf32>
      %36 = arith.addf %33, %35 : vector<1x128xf32>
      %37 = arith.index_cast %31 : i32 to index
      %c0_29 = arith.constant 0 : index
      %38 = vector.load %arg10[%37, %c0_29] : memref<8x128xf32, #tpu.memory_space<vmem>>, vector<1x128xf32>
      tpu.vector_store %arg10[%37, %c0_29], %36 {strides = array<i32>} : memref<8x128xf32, #tpu.memory_space<vmem>>, vector<1x128xf32>,
    }
    %c8_i32_21 = arith.constant 8 : i32
    %c1_i32_22 = arith.constant 1 : i32
    %21 = arith.cmpi eq, %arg1, %c1_i32_22 : i32
    %22 = arith.extui %21 : i1 to i32
    %c0_i32_23 = arith.constant 0 : i32
    %23 = arith.cmpi ne, %22, %c0_i32_23 : i32
    scf.if %23 {
      %c0_27 = arith.constant 0 : index
      %c0_28 = arith.constant 0 : index
      %29 = vector.load %arg10[%c0_27, %c0_28] : memref<8x128xf32, #tpu.memory_space<vmem>>, vector<8x128xf32>
      %c0_29 = arith.constant 0 : index
      %c0_30 = arith.constant 0 : index
      %30 = vector.load %arg9[%c0_29, %c0_30] : memref<8x128xf32, #tpu.memory_space<vmem>>, vector<8x128xf32>
      tpu.vector_store %arg9[%c0_29, %c0_30], %29 {strides = array<i32>} : memref<8x128xf32, #tpu.memory_space<vmem>>, vector<8x128xf32>,
    } else {
    }
    %c1_i32_24 = arith.constant 1 : i32
    %24 = arith.cmpi eq, %arg0, %c1_i32_24 : i32
    %c1_i32_25 = arith.constant 1 : i32
    %25 = arith.cmpi eq, %arg1, %c1_i32_25 : i32
    %26 = arith.andi %24, %25 : i1
    %27 = arith.extui %26 : i1 to i32
    %c0_i32_26 = arith.constant 0 : i32
    %28 = arith.cmpi ne, %27, %c0_i32_26 : i32
    scf.if %28 {
      %c0_27 = arith.constant 0 : index
      %c0_28 = arith.constant 0 : index
      %29 = vector.load %arg10[%c0_27, %c0_28] : memref<8x128xf32, #tpu.memory_space<vmem>>, vector<8x128xf32>
      %c0_29 = arith.constant 0 : index
      %c0_30 = arith.constant 0 : index
      %30 = vector.load %arg8[%c0_29, %c0_30] : memref<8x128xf32, #tpu.memory_space<vmem>>, vector<8x128xf32>
      tpu.vector_store %arg8[%c0_29, %c0_30], %29 {strides = array<i32>} : memref<8x128xf32, #tpu.memory_space<vmem>>, vector<8x128xf32>,
    } else {
    }
    return
  }
  func.func @transform_0(%arg0: i32, %arg1: i32, %arg2: memref<16xi32, #tpu.memory_space<smem>>, %arg3: memref<16xi32, #tpu.memory_space<smem>>) -> (i32, i32) {
    %c0_i32 = arith.constant 0 : i32
    %c0_i32_0 = arith.constant 0 : i32
    return %arg1, %c0_i32 : i32, i32
  }
  func.func @transform_1(%arg0: i32, %arg1: i32, %arg2: memref<16xi32, #tpu.memory_space<smem>>, %arg3: memref<16xi32, #tpu.memory_space<smem>>) -> (i32, i32) {
    %c0_i32 = arith.constant 0 : i32
    %c0_i32_0 = arith.constant 0 : i32
    %c0_i32_1 = arith.constant 0 : i32
    return %c0_i32, %c0_i32_0 : i32, i32
  }
  func.func @transform_2(%arg0: i32, %arg1: i32, %arg2: memref<16xi32, #tpu.memory_space<smem>>, %arg3: memref<16xi32, #tpu.memory_space<smem>>) -> (i32, i32, i32) {
    %c0_i32 = arith.constant 0 : i32
    %c0_i32_0 = arith.constant 0 : i32
    %c0_i32_1 = arith.constant 0 : i32
    return %arg0, %c0_i32, %c0_i32_0 : i32, i32, i32
  }
  func.func @transform_3(%arg0: i32, %arg1: i32, %arg2: memref<16xi32, #tpu.memory_space<smem>>, %arg3: memref<16xi32, #tpu.memory_space<smem>>) -> (i32, i32) {
    %c0_i32 = arith.constant 0 : i32
    %c0_i32_0 = arith.constant 0 : i32
    %c0_i32_1 = arith.constant 0 : i32
    return %c0_i32, %c0_i32_0 : i32, i32
  }
  func.func @transform_4(%arg0: i32, %arg1: i32, %arg2: memref<16xi32, #tpu.memory_space<smem>>, %arg3: memref<16xi32, #tpu.memory_space<smem>>) -> (i32, i32) {
    %c0_i32 = arith.constant 0 : i32
    %c0_i32_0 = arith.constant 0 : i32
    %c0_i32_1 = arith.constant 0 : i32
    return %c0_i32, %c0_i32_0 : i32, i32
  }
}

</mosaic_0001>

<bundles_post_ra>
// kernel: tpu_custom_call.1
= control target key start
LH: loop header
LB: loop body
LE: loop exit
PB: predicated region body
PF: predicated region fallthrough
CT: control target
= control target key end

     0   :  { %s2167_s0 = inlined_call_operand.vmem [shape: s32[16], index: 0, kind: input, shape index: {}]   ;;  %s2168_s2 = inlined_call_operand.vmem [shape: f32[16,8], index: 2, kind: input, shape index: {}]   ;;  %s2169_s3 = inlined_call_operand.vmem [shape: f32[8,128], index: 3, kind: input, shape index: {}]   ;;  %s2170_s4 = inlined_call_operand.hbm [shape: f32[2,1024,128], index: 4, kind: input, shape index: {}]   ;;  %s2171_s5 = inlined_call_operand.hbm [shape: f32[8,1024], index: 5, kind: input, shape index: {}]   ;;  %s2172_s6 = inlined_call_operand.hbm [shape: f32[8,128], index: 6, kind: output, shape index: {}]   ;;  %s2173_s1 = inlined_call_operand.vmem [shape: s32[16], index: 1, kind: input, shape index: {}]  }
   0x1   :  { %s11_s23 = sshll.u32 %s2167_s0, 4  ;;  %s15_s26 = sshll.u32 %s2173_s1, 4  ;;  %s12_s23 = int_to_ptr.vmem [resolvable:$true] %s11_s23  ;;  %s16_s26 = int_to_ptr.vmem [resolvable:$true] %s15_s26 }
   0x2   :  { %s1532_s27 = scalar_lea.vmem %s12_s23, 16  ;;  %p1537_p1 = scmp.lt.s32.totalorder %s12_s23, %s12_s23 }
   0x3   :  { %p1533_p0 = scmp.ne.s32.totalorder %s12_s23, %s1532_s27  ;;  %p1538_p2 = scmp.lt.s32.totalorder %s1532_s27, %s1532_s27 }
   0x5   :  { %p1539_p3 = por %p1538_p2, %p1537_p1 }
   0x7   :  { %p1540_p4 = pnand %p1539_p3, %p1533_p0 }
   0x9   :  { %1543 = shalt.err (!%p1540_p4)  }
   0xa   :  { %s1734_s28 = smov [#allocation7]   ;;  %s1544_s29 = scalar_lea.vmem %s16_s26, 16 }
   0xb   :  { %14 = dma.vmem_to_smem %s12_s23, 16, %s1734_s28, [#allocation6] }
   0xc   :  { %p1545_p5 = scmp.ne.s32.totalorder %s16_s26, %s1544_s29  ;;  %p1549_p6 = scmp.lt.s32.totalorder %s16_s26, %s16_s26 }
   0xd   :  { %p1550_p7 = scmp.lt.s32.totalorder %s1544_s29, %s1544_s29 }
   0xf   :  { %p1551_p8 = por %p1550_p7, %p1549_p6 }
  0x11   :  { %p1552_p9 = pnand %p1551_p8, %p1545_p5 }
  0x13   :  { %1555 = shalt.err (!%p1552_p9)  }
  0x14   :  { %s1735_s0 = smov [#allocation8]  }
  0x15   :  { %18 = dma.vmem_to_smem %s16_s26, 16, %s1735_s0, [#allocation6] }
  0x16   :  { %1680 = dma.done.wait [#allocation6], 32 }
  0x17   :  { %1681 = vsyncadd [#allocation6], 4294967264 }
  0x18   :  { %20 = sfence }
  0x19   :  { %21 = vsyncpa [#allocation10], 0 }
  0x1a   :  { %23 = vsyncpa [#allocation10 + $0x1], 0 }
  0x1b   :  { %24 = vsyncpa [#allocation13], 0 }
  0x1c   :  { %25 = vsyncpa [#allocation11], 0  ;;  %s1784_s1 = smov 0   ;;  %s1786_s30 = smov 0  }
  0x1d   :  { %s1788_s7 = smov 0   ;;  %s1790_s8 = smov 0  }
  0x1e   :  { %s1792_s9 = smov 0   ;;  %s1794_s10 = smov 0  }
  0x1f   :  { %s1796_s11 = smov 0   ;;  %s1798_s12 = smov 0  }
  0x20 LB: > { %s2179_s13 = sadd.s32 4294967295, %s1724_s12   ;;  %p104_p10 = scmp.ne.s32.totalorder %s1704_s7, %s1700_s30  ;;  %s1724_s12 = sphi %s1798_s12, %s31_s12   ;;  %s1720_s11 = sphi %s1796_s11, %s2199_s11   ;;  %s1716_s10 = sphi %s1794_s10, %s2198_s10   ;;  %s1712_s9 = sphi %s1792_s9, %s2197_s9   ;;  %s1708_s8 = sphi %s1790_s8, %s2196_s8   ;;  %s1704_s7 = sphi %s1788_s7, %s2195_s7   ;;  %s1700_s30 = sphi %s1786_s30, %s2194_s30   ;;  %s1696_s1 = sphi %s1784_s1, %s2193_s1  }
  0x21   : > { %p105_p11 = scmp.eq.s32.totalorder %s1724_s12, 0  ;;  %p110_p12 = scmp.ne.s32.totalorder %s1700_s30, %s1696_s1 }
  0x22   : > { %p1829_p13 = scmp.eq.s32.totalorder %s2179_s13, 0  ;;  %p1131_p1 = scmp.ge.s32.totalorder %s1724_s12, 1 }
  0x23   : > { %p106_p0 = por %p105_p11, %p104_p10  ;;  %p163_p3 = scmp.lt.s32.totalorder %s1724_s12, 5 }
  0x24   : > { %s2180_s14 = scalar_select %p1829_p13, 1, 0 }
  0x25   : > { %p1836_p2 = por %p1829_p13, %p110_p12  ;;  %p1841_p4 = pnand %p1131_p1, %p163_p3 }
  0x26   : > { %s1736_s17 = smov [#allocation12]   ;;  %p1440_p6 = scmp.lt.s32.totalorder %s1724_s12, 4 }
  0x27   : > { %s2181_s15 = scalar_select %p1836_p2, 1, 0 }
  0x28   : > { %s2182_s16 = scalar_select %p1841_p4, 1, 0 }
  0x29   : > { %s179_s18 = sshll.u32 %s1736_s17, 4  ;;  %p1431_p5 = pneg %p1841_p4  ;;  %s180_s18 = int_to_ptr.vmem [resolvable:$true] %s179_s18 }
  0x2a   : > { %p1854_p8 = pnand %p1440_p6, %p106_p0  ;;  %s1556_s23 = scalar_lea.hbm %s2171_s5, 1024 }
  0x2b   : > { %p1850_p7 = pnand %p1431_p5, %p1829_p13  ;;  %p1557_p9 = scmp.ne.s32.totalorder %s2171_s5, %s1556_s23 }
  0x2c   : > { %s2184_s20 = scalar_select %p1854_p8, 1, 0 }
  0x2d   : > { %p1558_p10 = pneg %p1850_p7  ;;  %p1563_p1 = scmp.lt.u32.totalorder %s1556_s23, %s2171_s5 }
  0x2f   : > { %p1559_p11 = pnand %p1558_p10, %p1557_p9 }
  0x31   : > { %p1560_p12 = pneg %p1559_p11 }
  0x33   : > { %p1565_p0 = pnand %p1563_p1, %p1560_p12 }
  0x35   : > { %1568 = shalt.err (!%p1565_p0)
}
  0x36   : > { %s1569_s28 = scalar_lea.vmem %s180_s18, 1024  ;;  %p1577_p13 = scmp.lt.s32.totalorder %s180_s18, %s180_s18 }
  0x37   : > { %p1570_p3 = scmp.ne.s32.totalorder %s180_s18, %s1569_s28  ;;  %p1578_p2 = scmp.lt.s32.totalorder %s1569_s28, %s1569_s28 }
  0x39   : > { %p1572_p5 = pnand %p1570_p3, %p1558_p10  ;;  %p1579_p4 = por %p1578_p2, %p1577_p13 }
  0x3b   : > { %p1573_p6 = pneg %p1572_p5 }
  0x3d   : > { %p1580_p8 = pnand %p1579_p4, %p1573_p6 }
  0x3f   : > { %1583 = shalt.err (!%p1580_p8)
}
  0x40   : > { %1434 = dma.hbm_to_vmem [thread:$0]  (!%p1850_p7), %s2171_s5, 1024, %s180_s18, [#allocation13]  }
  0x41   : > { %s40_s1 = sadd.s32 1, %s1716_s10  ;;  %s43_s17 = sadd.s32 1, %s1720_s11 }
  0x42   : > { %p41_p9 = scmp.ge.s32.totalorder %s40_s1, 2  ;;  %s197_s21 = sand.u32 1, %s1704_s7  }
  0x43   : > { %s1134_s22 = sshll.u32 %s197_s21, 10  ;;  %s1152_s19 = sshll.u32 %s1720_s11, 14 }
  0x44   : > { %s2201_s1 = smov (%p41_p9, %s40_s1), 0  ;;  %s2203_s17 = smov (!%p41_p9, %s43_s17), %s1720_s11 }
  0x45   : > { %p45_p13 = scmp.ge.s32.totalorder %s2203_s17, 2  ;;  %s1884_s25 = scalar_lea.hbm %s2170_s4, %s1152_s19 }
  0x46   : > { %s201_s18 = scalar_lea.vmem [#allocation9], %s1134_s22  ;;  %s97_s27 = sadd.s32 1, %s1704_s7 }
  0x47   : > { %s208_s26 = sshll.u32 %s201_s18, 4  ;;  %s2205_s17 = smov (%p45_p13, %s2203_s17), 0  ;;  %s1888_s26 = int_to_ptr.vmem [resolvable:$true] %s208_s26 }
  0x48   : > { %s94_s28 = ssub.s32 %s1720_s11, %s2205_s17  ;;  %s1897_s0 = scalar_lea.sflag [#allocation10], %s197_s21 }
  0x49   : > { %p1893_p2 = scmp.eq.s32.totalorder %s94_s28, 0  ;;  %s1584_s19 = scalar_lea.hbm %s1884_s25, 16384 }
  0x4a   : > { %p1585_p4 = scmp.ne.s32.totalorder %s1884_s25, %s1584_s19  ;;  %p2186_p7 = scmp.ne.s32.totalorder %s2184_s20, 0 }
  0x4b   : > { %s1589_s24 = scalar_lea.hbm %s2170_s4, 32768  ;;  %p1590_p12 = scmp.lt.u32.totalorder %s1884_s25, %s2170_s4 }
  0x4c   : > { %p1586_p8 = pneg %p2186_p7  ;;  %p1591_p1 = scmp.lt.u32.totalorder %s1589_s24, %s1584_s19 }
  0x4d   : > { %p1593_p3 = scmp.lt.u32.totalorder %s1584_s19, %s1884_s25 }
  0x4e   : > { %p1587_p10 = pnand %p1586_p8, %p1585_p4  ;;  %p1592_p0 = por %p1591_p1, %p1590_p12 }
  0x50   : > { %p1588_p11 = pneg %p1587_p10  ;;  %p1594_p5 = por %p1593_p3, %p1592_p0 }
  0x52   : > { %p1595_p6 = pnand %p1594_p5, %p1588_p11 }
  0x54   : > { %1598 = shalt.err (!%p1595_p6)
}
  0x55   : > { %s1599_s21 = scalar_lea.vmem %s1888_s26, 16384  ;;  %s1737_s28 = smov [#allocation9]  }
  0x56   : > { %p1600_p9 = scmp.ne.s32.totalorder %s1888_s26, %s1599_s21  ;;  %s1604_s22 = sshll.u32 %s1737_s28, 4  ;;  %s1605_s22 = int_to_ptr.vmem [resolvable:$false] %s1604_s22 }
  0x57   : > { %s1606_s13 = scalar_lea.vmem %s1605_s22, 32768  ;;  %p1607_p10 = scmp.lt.s32.totalorder %s1888_s26, %s1605_s22 }
  0x58   : > { %p1602_p13 = pnand %p1600_p9, %p1586_p8  ;;  %p1608_p12 = scmp.lt.s32.totalorder %s1606_s13, %s1599_s21 }
  0x5a   : > { %p1603_p4 = pneg %p1602_p13  ;;  %p1609_p1 = por %p1608_p12, %p1607_p10 }
  0x5c   : > { %p1610_p0 = pnand %p1609_p1, %p1603_p4 }
  0x5e   : > { %1613 = shalt.err (!%p1610_p0)
}
  0x5f   : > { %s1738_s19 = smov 128   ;;  %s1739_s23 = smov 8  }
  0x60   : > { %1438 = dma.hbm_to_vmem [thread:$0]  (!%p2186_p7), %s1884_s25, 16384, %s1888_s26, %s1897_s0, %s1738_s19, %s1738_s19, %s1739_s23  }
  0x61   : > { %s1930_s24 = scalar_select %p1893_p2, %s1704_s7, %s97_s27  }
  0x62   : > { %p2187_p8 = scmp.ne.s32.totalorder %s2182_s16, 0 }
  0x63   : > { %s222_s18 = sand.u32 (!%p2187_p8), 1, %s1700_s30   ;;  %p2188_p11 = scmp.ne.s32.totalorder (!%p2187_p8), %s2181_s15, 0 }
  0x64   : > { %220 = sbr.rel (%p2187_p8) target bundleno = 664 (0x298), region = 36  ;;  %s1138_s21 = sshll.u32 (!%p2187_p8), %s222_s18, 10 }
  0x65   : > { %s223_s28 = scalar_lea.sflag (!%p2187_p8), [#allocation10], %s222_s18  ;;  %s1935_s22 = scalar_lea.vmem (!%p2187_p8), [#allocation9], %s1138_s21 }
  0x6b   : > { %1683 = dma.done.wait (%p2188_p11), %s223_s28, 16384  }
  0x6c   : > { %1685 = vsyncadd (%p2188_p11), %s223_s28, 4294950912  ;;  %p2189_p7 = scmp.ne.s32.totalorder %s2180_s14, 0 }
  0x6e   : > { %1687 = dma.done.wait (%p2189_p7), [#allocation13], 1024  }
  0x6f   : > { %1689 = vsyncadd (%p2189_p7), [#allocation13], 4294966272  ;;  %p254_p2 = scmp.lt.s32.totalorder %s1708_s8, 1  ;;  %p258_p3 = scmp.eq.s32.totalorder %s1712_s9, 0 }
  0x70   : > { %p259_p5 = scmp.eq.s32.totalorder %s1708_s8, 0 }
  0x71   : > { %s255_s16 = scalar_select %p254_p2, %s1708_s8, 1 }
  0x72   : > { %p260_p6 = pnand %p259_p5, %p258_p3 }
  0x73   : > { %s1140_s20 = sshll.u32 %s255_s16, 3  ;;  %v264_v0 = vld [vmem:[%s2169_s3] sm:$0xff] (!%p260_p6) }
  0x74   : > { %s1952_s15 = scalar_lea.vmem %s2168_s2, %s1140_s20  ;;  %263 = sbr.rel (%p260_p6) target bundleno = 123 (0x7b), region = 48  ;;  %265 = vst [vmem:[#allocation2] sm:$0xff] (!%p260_p6), %v264_v0 }
  0x7b PF: > { %p1141_p9 = scmp.ne.s32.totalorder %s1708_s8, 0 }
  0x7c   : > { %v1740_v1 = vmov (!%p1141_p9), 0.0  }
  0x7d   : > { %268 = sbr.rel (%p1141_p9) target bundleno = 132 (0x84), region = 52  ;;  %269 = vst [vmem:[#allocation3] sm:$0xff] (!%p1141_p9), %v1740_v1 }
  0x84 PF: > { %s1142_s14 = sshll.u32 %s1708_s8, 3  ;;  %s1726_s0 = smov 0  }
  0x85 LB: >> { %s277_s13 = sadd.s32 %s1728_s0, %s1142_s14  ;;  %s281_s18 = scalar_lea.vmem [#allocation4], %s1728_s0  ;;  %s1728_s0 = sphi %s1726_s0, %s276_s0  }
  0x86   : >> { %s278_s19 = sld [smem:[#allocation7 + %s277_s13]]  ;;  %s276_s0 = sadd.s32 1, %s1728_s0  }
  0x87   : >> { %p273_p13 = scmp.ge.s32.totalorder %s276_s0, 8  }
  0x88   : > { %v286_v3 = vld [vmem:[#allocation12 + $0x8] sm:$0xff] (%p273_p13)  ;;  %v288_v4 = vld [vmem:[#allocation12 + $0x18] sm:$0xff] (%p273_p13)  ;;  %v285_v5 = vld [vmem:[#allocation12] sm:$0xff] (%p273_p13)  ;;  %vm293_vm0 = vcmask (%p273_p13), 64512   ;;  %v1741_v9 = vmov (%p273_p13), 0.0   ;;  %s1730_s21 = smov (%p273_p13), 0  }
  0x89   : > { %275 = sbr.rel (!%p273_p13) target bundleno = 133 (0x85), region = 114  ;;  %297 = vmatprep.subr.mxu0 (%p273_p13), %v286_v3  ;;  %368 = vmatprep.subr.mxu1 (%p273_p13), %v288_v4  ;;  %v287_v6 = vld [vmem:[#allocation12 + $0x10] sm:$0xff] (%p273_p13)  ;;  %v283_v7 = vld [vmem:[%s1952_s15] sm:$0xff] (%p273_p13)  ;;  %v290_v8 = vld [vmem:[#allocation12 + $0x28] sm:$0xff] (%p273_p13) }
  0x8a   : > { %298 = vmatpush1.msra.mxu0 (%p273_p13), %v285_v5  ;;  %361 = vmatprep.mubr.f32.mxu0 (%p273_p13), %v1741_v9  ;;  %v289_v10 = vld [vmem:[#allocation12 + $0x20] sm:$0xff] (%p273_p13)  ;;  %v292_v11 = vld [vmem:[#allocation12 + $0x38] sm:$0xff] (%p273_p13)  ;;  %v291_v12 = vld [vmem:[#allocation12 + $0x30] sm:$0xff] (%p273_p13) }
  0x8b   : > { %369 = vmatpush1.msra.mxu1 (%p273_p13), %v287_v6  ;;  %432 = vmatprep.mubr.f32.mxu1 (%p273_p13), %v1741_v9  ;;  %v605_v13 = vld [vmem:[%s1935_s22 + $0x80] sm:$0xff] (%p273_p13)  ;;  %v606_v14 = vld [vmem:[%s1935_s22 + $0x88] sm:$0xff] (%p273_p13)  ;;  %v607_v23 = vld [vmem:[%s1935_s22 + $0x90] sm:$0xff] (%p273_p13) }
  0x8c   : >> { %s279_s23 = scalar_lea.vmem [#allocation2], %s278_s19  ;;  %v637_v15 = vld [vmem:[%s1935_s22 + $0x180] sm:$0xff] (%p273_p13)  ;;  %1143 = vmatmul.mubr.msk.f32.vlgmr.msra.gmra.mrb[0].mxu0 (%p273_p13), %vm293_vm0, %v283_v7  ;;  %1144 = vmatmul.mubr.msk.f32.vlgmr.msra.gmra.mrb[0].mxu1 (%p273_p13), %vm293_vm0, %v283_v7  ;;  %v638_v16 = vld [vmem:[%s1935_s22 + $0x188] sm:$0xff] (%p273_p13)  ;;  %v1293_v19 = vpack.c.bf16 (%p273_p13), %v606_v14, %v605_v13  ;;  %v608_v26 = vld [vmem:[%s1935_s22 + $0x98] sm:$0xff] (%p273_p13) }
  0x8d   : >> { %v280_v2 = vld [vmem:[%s279_s23] sm:$0x1]  ;;  %v590_v18 = vld [vmem:[%s1935_s22 + $0x8] sm:$0xff] (%p273_p13)  ;;  %439 = vmatprep.subr.mxu0 (%p273_p13), %v290_v8  ;;  %510 = vmatprep.subr.mxu1 (%p273_p13), %v292_v11  ;;  %v1325_v20 = vpack.c.bf16 (%p273_p13), %v638_v16, %v637_v15  ;;  %v639_v27 = vld [vmem:[%s1935_s22 + $0x190] sm:$0xff] (%p273_p13)  ;;  %v1297_v29 = vpack.c.bf16 (%p273_p13), %v608_v26, %v607_v23 }
  0x8e   : >> { %282 = vst [vmem:[%s281_s18] sm:$0x1] %v280_v2  ;;  %v589_v17 = vld [vmem:[%s1935_s22] sm:$0xff] (%p273_p13)  ;;  %v622_v22 = vld [vmem:[%s1935_s22 + $0x108] sm:$0xff] (%p273_p13)  ;;  %440 = vmatpush1.msra.mxu0 (%p273_p13), %v289_v10  ;;  %503 = vmatprep.mubr.f32.mxu0 (%p273_p13), %v1741_v9  ;;  %v640_v28 = vld [vmem:[%s1935_s22 + $0x198] sm:$0xff] (%p273_p13) }
  0x8f   : > { %v621_v21 = vld [vmem:[%s1935_s22 + $0x100] sm:$0xff] (%p273_p13)  ;;  %v1295_v24 = vpack.c.bf16 (%p273_p13), %v590_v18, %v589_v17  ;;  %511 = vmatpush1.msra.mxu1 (%p273_p13), %v291_v12  ;;  %574 = vmatprep.mubr.f32.mxu1 (%p273_p13), %v1741_v9  ;;  %v1329_v30 = vpack.c.bf16 (%p273_p13), %v640_v28, %v639_v27  ;;  %v591_v31 = vld [vmem:[%s1935_s22 + $0x10] sm:$0xff] (%p273_p13)  ;;  %v592_v32 = vld [vmem:[%s1935_s22 + $0x18] sm:$0xff] (%p273_p13) }
  0x90   : > { %v1327_v25 = vpack.c.bf16 %v622_v22, %v621_v21  ;;  %v623_v33 = vld [vmem:[%s1935_s22 + $0x110] sm:$0xff]  ;;  %1145 = vmatmul.mubr.msk.f32.vlgmr.msra.gmra.mrb[2].mxu0 %vm293_vm0, %v283_v7  ;;  %1146 = vmatmul.mubr.msk.f32.vlgmr.msra.gmra.mrb[2].mxu1 %vm293_vm0, %v283_v7  ;;  %v624_v34 = vld [vmem:[%s1935_s22 + $0x118] sm:$0xff]  ;;  %v609_v35 = vld [vmem:[%s1935_s22 + $0xa0] sm:$0xff]  ;;  %v1299_v39 = vpack.c.bf16 %v592_v32, %v591_v31 }
  0x91   : > { %v610_v36 = vld [vmem:[%s1935_s22 + $0xa8] sm:$0xff]  ;;  %1294 = vmatprep.subr.bf16.mxu0 %v1293_v19  ;;  %1326 = vmatprep.subr.bf16.mxu1 %v1325_v20  ;;  %v641_v37 = vld [vmem:[%s1935_s22 + $0x1a0] sm:$0xff]  ;;  %v1331_v40 = vpack.c.bf16 %v624_v34, %v623_v33  ;;  %v611_v47 = vld [vmem:[%s1935_s22 + $0xb0] sm:$0xff] }
  0x92   : > { %v642_v38 = vld [vmem:[%s1935_s22 + $0x1a8] sm:$0xff]  ;;  %1296 = vmatpush3.bf16.msra.mxu0 %v1295_v24  ;;  %1328 = vmatpush3.bf16.msra.mxu1 %v1327_v25  ;;  %v593_v41 = vld [vmem:[%s1935_s22 + $0x20] sm:$0xff]  ;;  %v1301_v43 = vpack.c.bf16 %v610_v36, %v609_v35  ;;  %v612_v48 = vld [vmem:[%s1935_s22 + $0xb8] sm:$0xff] }
  0x93   : > { %v594_v42 = vld [vmem:[%s1935_s22 + $0x28] sm:$0xff]  ;;  %1298 = vmatprep.subr.bf16.mxu0 %v1297_v29  ;;  %1330 = vmatprep.subr.bf16.mxu1 %v1329_v30  ;;  %v1333_v44 = vpack.c.bf16 %v642_v38, %v641_v37  ;;  %v625_v45 = vld [vmem:[%s1935_s22 + $0x120] sm:$0xff]  ;;  %v643_v49 = vld [vmem:[%s1935_s22 + $0x1b0] sm:$0xff]  ;;  %v1305_v55 = vpack.c.bf16 %v612_v48, %v611_v47 }
  0x94   : > { %v626_v46 = vld [vmem:[%s1935_s22 + $0x128] sm:$0xff]  ;;  %v644_v50 = vld [vmem:[%s1935_s22 + $0x1b8] sm:$0xff]  ;;  %v1303_v51 = vpack.c.bf16 %v594_v42, %v593_v41  ;;  %v595_v53 = vld [vmem:[%s1935_s22 + $0x30] sm:$0xff] }
  0x95   : > { %v1335_v52 = vpack.c.bf16 %v626_v46, %v625_v45  ;;  %v596_v54 = vld [vmem:[%s1935_s22 + $0x38] sm:$0xff]  ;;  %v1337_v56 = vpack.c.bf16 %v644_v50, %v643_v49  ;;  %v627_v57 = vld [vmem:[%s1935_s22 + $0x130] sm:$0xff]  ;;  %v613_v59 = vld [vmem:[%s1935_s22 + $0xc0] sm:$0xff] }
  0x96   : > { %1300 = vmatpush3.bf16.msra.mxu0 %v1299_v39  ;;  %1332 = vmatpush3.bf16.msra.mxu1 %v1331_v40  ;;  %v628_v58 = vld [vmem:[%s1935_s22 + $0x138] sm:$0xff]  ;;  %v614_v60 = vld [vmem:[%s1935_s22 + $0xc8] sm:$0xff]  ;;  %v645_v61 = vld [vmem:[%s1935_s22 + $0x1c0] sm:$0xff]  ;;  %v1307_v63 = vpack.c.bf16 %v596_v54, %v595_v53 }
  0x97   : > { %1302 = vmatprep.subr.bf16.mxu0 %v1301_v43  ;;  %1334 = vmatprep.subr.bf16.mxu1 %v1333_v44  ;;  %v646_v62 = vld [vmem:[%s1935_s22 + $0x1c8] sm:$0xff]  ;;  %v1339_v0 = vpack.c.bf16 %v628_v58, %v627_v57  ;;  %v597_v1 = vld [vmem:[%s1935_s22 + $0x40] sm:$0xff]  ;;  %v1309_v3 = vpack.c.bf16 %v614_v60, %v613_v59  ;;  %v615_v7 = vld [vmem:[%s1935_s22 + $0xd0] sm:$0xff] }
  0x98   : > { %v598_v2 = vld [vmem:[%s1935_s22 + $0x48] sm:$0xff]  ;;  %v1341_v4 = vpack.c.bf16 %v646_v62, %v645_v61  ;;  %v629_v5 = vld [vmem:[%s1935_s22 + $0x140] sm:$0xff]  ;;  %v616_v8 = vld [vmem:[%s1935_s22 + $0xd8] sm:$0xff] }
  0x99   : > { %v630_v6 = vld [vmem:[%s1935_s22 + $0x148] sm:$0xff]  ;;  %v647_v9 = vld [vmem:[%s1935_s22 + $0x1d0] sm:$0xff]  ;;  %v648_v10 = vld [vmem:[%s1935_s22 + $0x1d8] sm:$0xff]  ;;  %v1311_v11 = vpack.c.bf16 %v598_v2, %v597_v1  ;;  %v1313_v15 = vpack.c.bf16 %v616_v8, %v615_v7 }
  0x9a   : > { %1304 = vmatpush3.bf16.msra.mxu0 %v1303_v51  ;;  %1336 = vmatpush3.bf16.msra.mxu1 %v1335_v52  ;;  %v1343_v12 = vpack.c.bf16 %v630_v6, %v629_v5  ;;  %v599_v13 = vld [vmem:[%s1935_s22 + $0x50] sm:$0xff]  ;;  %v600_v14 = vld [vmem:[%s1935_s22 + $0x58] sm:$0xff]  ;;  %v1345_v16 = vpack.c.bf16 %v648_v10, %v647_v9  ;;  %v617_v19 = vld [vmem:[%s1935_s22 + $0xe0] sm:$0xff] }
  0x9b   : > { %1306 = vmatprep.subr.bf16.mxu0 %v1305_v55  ;;  %1338 = vmatprep.subr.bf16.mxu1 %v1337_v56  ;;  %v631_v17 = vld [vmem:[%s1935_s22 + $0x150] sm:$0xff]  ;;  %v632_v18 = vld [vmem:[%s1935_s22 + $0x158] sm:$0xff]  ;;  %v618_v20 = vld [vmem:[%s1935_s22 + $0xe8] sm:$0xff]  ;;  %v1315_v23 = vpack.c.bf16 %v600_v14, %v599_v13 }
  0x9c   : > { %v649_v21 = vld [vmem:[%s1935_s22 + $0x1e0] sm:$0xff]  ;;  %v650_v22 = vld [vmem:[%s1935_s22 + $0x1e8] sm:$0xff]  ;;  %v1347_v24 = vpack.c.bf16 %v632_v18, %v631_v17  ;;  %v1317_v26 = vpack.c.bf16 %v618_v20, %v617_v19  ;;  %v619_v33 = vld [vmem:[%s1935_s22 + $0xf0] sm:$0xff] }
  0x9d   : > { %v601_v25 = vld [vmem:[%s1935_s22 + $0x60] sm:$0xff]  ;;  %v1349_v27 = vpack.c.bf16 %v650_v22, %v649_v21  ;;  %v602_v28 = vld [vmem:[%s1935_s22 + $0x68] sm:$0xff]  ;;  %v620_v34 = vld [vmem:[%s1935_s22 + $0xf8] sm:$0xff] }
  0x9e   : > { %1308 = vmatpush3.bf16.msra.mxu0 %v1307_v63  ;;  %1340 = vmatpush3.bf16.msra.mxu1 %v1339_v0  ;;  %v633_v29 = vld [vmem:[%s1935_s22 + $0x160] sm:$0xff]  ;;  %v634_v30 = vld [vmem:[%s1935_s22 + $0x168] sm:$0xff]  ;;  %v1319_v31 = vpack.c.bf16 %v602_v28, %v601_v25  ;;  %v651_v35 = vld [vmem:[%s1935_s22 + $0x1f0] sm:$0xff]  ;;  %v1321_v36 = vpack.c.bf16 %v620_v34, %v619_v33 }
  0x9f   : > { %1310 = vmatprep.subr.bf16.mxu0 %v1309_v3  ;;  %1342 = vmatprep.subr.bf16.mxu1 %v1341_v4  ;;  %v1351_v32 = vpack.c.bf16 %v634_v30, %v633_v29  ;;  %v652_v37 = vld [vmem:[%s1935_s22 + $0x1f8] sm:$0xff]  ;;  %v603_v38 = vld [vmem:[%s1935_s22 + $0x70] sm:$0xff]  ;;  %v669_v45 = vld [vmem:[%s1935_s22 + $0x280] sm:$0xff] }
  0xa0   : > { %v604_v39 = vld [vmem:[%s1935_s22 + $0x78] sm:$0xff]  ;;  %v1353_v40 = vpack.c.bf16 %v652_v37, %v651_v35  ;;  %v635_v42 = vld [vmem:[%s1935_s22 + $0x170] sm:$0xff]  ;;  %v670_v46 = vld [vmem:[%s1935_s22 + $0x288] sm:$0xff] }
  0xa1   : > { %v1323_v41 = vpack.c.bf16 %v604_v39, %v603_v38  ;;  %v636_v43 = vld [vmem:[%s1935_s22 + $0x178] sm:$0xff]  ;;  %v701_v47 = vld [vmem:[%s1935_s22 + $0x380] sm:$0xff]  ;;  %v1357_v48 = vpack.c.bf16 %v670_v46, %v669_v45  ;;  %v702_v49 = vld [vmem:[%s1935_s22 + $0x388] sm:$0xff] }
  0xa2   : > { %1312 = vmatpush3.bf16.msra.mxu0 %v1311_v11  ;;  %1344 = vmatpush3.bf16.msra.mxu1 %v1343_v12  ;;  %v1355_v44 = vpack.c.bf16 %v636_v43, %v635_v42  ;;  %v1389_v50 = vpack.c.bf16 %v702_v49, %v701_v47  ;;  %v2034_v51 = vld [vmem:[#allocation4] sm:$0xff]  ;;  %v653_v52 = vld [vmem:[%s1935_s22 + $0x200] sm:$0xff]  ;;  %v654_v53 = vld [vmem:[%s1935_s22 + $0x208] sm:$0xff] }
  0xa3   : > { %1314 = vmatprep.subr.bf16.mxu0 %v1313_v15  ;;  %1346 = vmatprep.subr.bf16.mxu1 %v1345_v16  ;;  %v685_v54 = vld [vmem:[%s1935_s22 + $0x300] sm:$0xff]  ;;  %v686_v55 = vld [vmem:[%s1935_s22 + $0x308] sm:$0xff]  ;;  %v671_v56 = vld [vmem:[%s1935_s22 + $0x290] sm:$0xff]  ;;  %v1359_v3 = vpack.c.bf16 %v654_v53, %v653_v52 }
  0xa4   : > { %v672_v59 = vld [vmem:[%s1935_s22 + $0x298] sm:$0xff]  ;;  %v703_v60 = vld [vmem:[%s1935_s22 + $0x390] sm:$0xff]  ;;  %v1391_v4 = vpack.c.bf16 %v686_v55, %v685_v54  ;;  %v673_v12 = vld [vmem:[%s1935_s22 + $0x2a0] sm:$0xff] }
  0xa5   : > { %v704_v61 = vld [vmem:[%s1935_s22 + $0x398] sm:$0xff]  ;;  %v655_v5 = vld [vmem:[%s1935_s22 + $0x210] sm:$0xff]  ;;  %v1361_v8 = vpack.c.bf16 %v672_v59, %v671_v56  ;;  %v674_v13 = vld [vmem:[%s1935_s22 + $0x2a8] sm:$0xff] }
  0xa6   : > { %1316 = vmatpush3.bf16.msra.mxu0 %v1315_v23  ;;  %1348 = vmatpush3.bf16.msra.mxu1 %v1347_v24  ;;  %v656_v6 = vld [vmem:[%s1935_s22 + $0x218] sm:$0xff]  ;;  %v1393_v9 = vpack.c.bf16 %v704_v61, %v703_v60  ;;  %v687_v10 = vld [vmem:[%s1935_s22 + $0x310] sm:$0xff]  ;;  %v705_v14 = vld [vmem:[%s1935_s22 + $0x3a0] sm:$0xff] }
  0xa7   : > { %1318 = vmatprep.subr.bf16.mxu0 %v1317_v26  ;;  %1350 = vmatprep.subr.bf16.mxu1 %v1349_v27  ;;  %v688_v11 = vld [vmem:[%s1935_s22 + $0x318] sm:$0xff]  ;;  %v706_v15 = vld [vmem:[%s1935_s22 + $0x3a8] sm:$0xff]  ;;  %v1363_v18 = vpack.c.bf16 %v656_v6, %v655_v5  ;;  %v657_v22 = vld [vmem:[%s1935_s22 + $0x220] sm:$0xff]  ;;  %v1365_v26 = vpack.c.bf16 %v674_v13, %v673_v12 }
  0xa8   : > { %v1395_v21 = vpack.c.bf16 %v688_v11, %v687_v10  ;;  %v658_v23 = vld [vmem:[%s1935_s22 + $0x228] sm:$0xff]  ;;  %v1397_v27 = vpack.c.bf16 %v706_v15, %v705_v14  ;;  %v689_v28 = vld [vmem:[%s1935_s22 + $0x320] sm:$0xff]  ;;  %v675_v30 = vld [vmem:[%s1935_s22 + $0x2b0] sm:$0xff] }
  0xa9   : > { %v690_v29 = vld [vmem:[%s1935_s22 + $0x328] sm:$0xff]  ;;  %v708_v33 = vld [vmem:[%s1935_s22 + $0x3b8] sm:$0xff]  ;;  %v1367_v34 = vpack.c.bf16 %v658_v23, %v657_v22  ;;  %v677_v42 = vld [vmem:[%s1935_s22 + $0x2c0] sm:$0xff] }
  0xaa   : > { %1320 = vmatpush3.bf16.msra.mxu0 %v1319_v31  ;;  %1352 = vmatpush3.bf16.msra.mxu1 %v1351_v32  ;;  %v676_v31 = vld [vmem:[%s1935_s22 + $0x2b8] sm:$0xff]  ;;  %v707_v32 = vld [vmem:[%s1935_s22 + $0x3b0] sm:$0xff]  ;;  %v1399_v35 = vpack.c.bf16 %v690_v29, %v689_v28  ;;  %v678_v43 = vld [vmem:[%s1935_s22 + $0x2c8] sm:$0xff] }
  0xab   : > { %1322 = vmatprep.subr.bf16.mxu0 %v1321_v36  ;;  %1354 = vmatprep.subr.bf16.mxu1 %v1353_v40  ;;  %v659_v36 = vld [vmem:[%s1935_s22 + $0x230] sm:$0xff]  ;;  %v660_v37 = vld [vmem:[%s1935_s22 + $0x238] sm:$0xff]  ;;  %v1369_v38 = vpack.c.bf16 %v676_v31, %v675_v30  ;;  %v1401_v39 = vpack.c.bf16 %v708_v33, %v707_v32  ;;  %v710_v45 = vld [vmem:[%s1935_s22 + $0x3c8] sm:$0xff] }
  0xac   : > { %v691_v40 = vld [vmem:[%s1935_s22 + $0x330] sm:$0xff]  ;;  %v1371_v46 = vpack.c.bf16 %v660_v37, %v659_v36  ;;  %v662_v49 = vld [vmem:[%s1935_s22 + $0x248] sm:$0xff]  ;;  %v693_v53 = vld [vmem:[%s1935_s22 + $0x340] sm:$0xff] }
  0xad   : > { %v694_v54 = vld [vmem:[%s1935_s22 + $0x348] sm:$0xff]  ;;  %v679_v55 = vld [vmem:[%s1935_s22 + $0x2d0] sm:$0xff]  ;;  %v680_v56 = vld [vmem:[%s1935_s22 + $0x2d8] sm:$0xff] }
  0xae   : > { %1324 = vmatpush3.bf16.msra.mxu0 %v1323_v41  ;;  %1356 = vmatpush3.bf16.msra.mxu1 %v1355_v44  ;;  %v692_v41 = vld [vmem:[%s1935_s22 + $0x338] sm:$0xff]  ;;  %v709_v44 = vld [vmem:[%s1935_s22 + $0x3c0] sm:$0xff]  ;;  %v1407_v60 = vpack.c.bf16 %v694_v54, %v693_v53  ;;  %v663_v61 = vld [vmem:[%s1935_s22 + $0x250] sm:$0xff] }
  0xaf   : > { %1358 = vmatprep.subr.bf16.mxu0 %v1357_v48  ;;  %1390 = vmatprep.subr.bf16.mxu1 %v1389_v50  ;;  %v1403_v47 = vpack.c.bf16 %v692_v41, %v691_v40  ;;  %v661_v48 = vld [vmem:[%s1935_s22 + $0x240] sm:$0xff]  ;;  %v1373_v50 = vpack.c.bf16 %v678_v43, %v677_v42  ;;  %v1405_v52 = vpack.c.bf16 %v710_v45, %v709_v44  ;;  %v714_v6 = vld [vmem:[%s1935_s22 + $0x3e8] sm:$0xff]  ;;  %v683_v15 = vld [vmem:[%s1935_s22 + $0x2f0] sm:$0xff] }
  0xb0   : > { %v1375_v59 = vpack.c.bf16 %v662_v49, %v661_v48  ;;  %v713_v5 = vld [vmem:[%s1935_s22 + $0x3e0] sm:$0xff]  ;;  %v666_v10 = vld [vmem:[%s1935_s22 + $0x268] sm:$0xff]  ;;  %v667_v23 = vld [vmem:[%s1935_s22 + $0x270] sm:$0xff] }
  0xb1   : > { %v1413_v12 = vpack.c.bf16 %v714_v6, %v713_v5  ;;  %v697_v13 = vld [vmem:[%s1935_s22 + $0x360] sm:$0xff]  ;;  %v698_v14 = vld [vmem:[%s1935_s22 + $0x368] sm:$0xff]  ;;  %v700_v28 = vld [vmem:[%s1935_s22 + $0x378] sm:$0xff] }
  0xb2   : > { %v1415_v22 = vpack.c.bf16 %v698_v14, %v697_v13 }
 0x15f   : > { %v363_v57 = vpop.f32.mrb[0].mxu0  ;;  %v434_v58 = vpop.f32.mrb[0].mxu1 }
 0x160   : > { %v583_v62 = vmul.f32 %v434_v58, %v2034_v51  ;;  %v365_v63 = vpop.f32.mrb[1].mxu0  ;;  %v436_v0 = vpop.f32.mrb[1].mxu1  ;;  %v581_v7 = vmul.f32 %v363_v57, %v2034_v51  ;;  %v711_v57 = vld [vmem:[%s1935_s22 + $0x3d0] sm:$0xff]  ;;  %v712_v58 = vld [vmem:[%s1935_s22 + $0x3d8] sm:$0xff] }
 0x161   : > { %v582_v1 = vmul.f32 %v365_v63, %v2034_v51  ;;  %v584_v2 = vmul.f32 %v436_v0, %v2034_v51  ;;  %v1377_v63 = vpack.c.bf16 %v680_v56, %v679_v55  ;;  %v1409_v0 = vpack.c.bf16 %v712_v58, %v711_v57 }
 0x163   : > { %781 = vmatprep.mubr.f32.mxu0 %v582_v1  ;;  %851 = vmatprep.mubr.f32.mxu1 %v584_v2  ;;  %v2056_v16 = vpop.f32.mrb[2].mxu0  ;;  %v2058_v17 = vpop.f32.mrb[2].mxu1  ;;  %v695_v1 = vld [vmem:[%s1935_s22 + $0x350] sm:$0xff]  ;;  %v696_v2 = vld [vmem:[%s1935_s22 + $0x358] sm:$0xff] }
 0x164   : > { %782 = vmatmul.mubr.f32.vlgmr.msra.gmra.mrb[4].mxu0 %v581_v7  ;;  %852 = vmatmul.mubr.f32.vlgmr.msra.gmra.mrb[4].mxu1 %v583_v62  ;;  %v507_v19 = vpop.f32.mrb[3].mxu0  ;;  %v578_v20 = vpop.f32.mrb[3].mxu1  ;;  %v664_v62 = vld [vmem:[%s1935_s22 + $0x258] sm:$0xff]  ;;  %v587_v31 = vmul.f32 %v2058_v17, %v2034_v51  ;;  %v585_v32 = vmul.f32 %v2056_v16, %v2034_v51 }
 0x165   : > { %1360 = vmatpush3.bf16.msra.mxu0 %v1359_v3  ;;  %1392 = vmatpush3.bf16.msra.mxu1 %v1391_v4  ;;  %v586_v24 = vmul.f32 %v507_v19, %v2034_v51  ;;  %v588_v25 = vmul.f32 %v578_v20, %v2034_v51  ;;  %v681_v3 = vld [vmem:[%s1935_s22 + $0x2e0] sm:$0xff]  ;;  %v682_v4 = vld [vmem:[%s1935_s22 + $0x2e8] sm:$0xff]  ;;  %v1379_v7 = vpack.c.bf16 %v664_v62, %v663_v61  ;;  %v715_v19 = vld [vmem:[%s1935_s22 + $0x3f0] sm:$0xff] }
 0x166   : > { %1362 = vmatprep.subr.bf16.mxu0 %v1361_v8  ;;  %1394 = vmatprep.subr.bf16.mxu1 %v1393_v9  ;;  %v1411_v8 = vpack.c.bf16 %v696_v2, %v695_v1  ;;  %v665_v9 = vld [vmem:[%s1935_s22 + $0x260] sm:$0xff]  ;;  %v1381_v11 = vpack.c.bf16 %v682_v4, %v681_v3  ;;  %v716_v20 = vld [vmem:[%s1935_s22 + $0x3f8] sm:$0xff] }
 0x167   : > { %921 = vmatprep.mubr.f32.mxu0 %v586_v24  ;;  %991 = vmatprep.mubr.f32.mxu1 %v588_v25  ;;  %v1417_v25 = vpack.c.bf16 %v716_v20, %v715_v19 }
 0x169   : > { %1364 = vmatpush3.bf16.msra.mxu0 %v1363_v18  ;;  %1396 = vmatpush3.bf16.msra.mxu1 %v1395_v21  ;;  %v684_v18 = vld [vmem:[%s1935_s22 + $0x2f8] sm:$0xff]  ;;  %v1383_v21 = vpack.c.bf16 %v666_v10, %v665_v9 }
 0x16a   : > { %1366 = vmatprep.subr.bf16.mxu0 %v1365_v26  ;;  %1398 = vmatprep.subr.bf16.mxu1 %v1397_v27  ;;  %v1385_v24 = vpack.c.bf16 %v684_v18, %v683_v15  ;;  %v668_v26 = vld [vmem:[%s1935_s22 + $0x278] sm:$0xff]  ;;  %v699_v27 = vld [vmem:[%s1935_s22 + $0x370] sm:$0xff] }
 0x16b   : > { %v1387_v29 = vpack.c.bf16 %v668_v26, %v667_v23  ;;  %v1419_v30 = vpack.c.bf16 %v700_v28, %v699_v27 }
 0x16d   : > { %1368 = vmatpush3.bf16.msra.mxu0 %v1367_v34  ;;  %1400 = vmatpush3.bf16.msra.mxu1 %v1399_v35 }
 0x16e   : > { %1370 = vmatprep.subr.bf16.mxu0 %v1369_v38  ;;  %1402 = vmatprep.subr.bf16.mxu1 %v1401_v39 }
 0x171   : > { %1372 = vmatpush3.bf16.msra.mxu0 %v1371_v46  ;;  %1404 = vmatpush3.bf16.msra.mxu1 %v1403_v47 }
 0x172   : > { %1374 = vmatprep.subr.bf16.mxu0 %v1373_v50  ;;  %1406 = vmatprep.subr.bf16.mxu1 %v1405_v52 }
 0x175   : > { %1376 = vmatpush3.bf16.msra.mxu0 %v1375_v59  ;;  %1408 = vmatpush3.bf16.msra.mxu1 %v1407_v60 }
 0x176   : > { %1378 = vmatprep.subr.bf16.mxu0 %v1377_v63  ;;  %1410 = vmatprep.subr.bf16.mxu1 %v1409_v0 }
 0x179   : > { %1380 = vmatpush3.bf16.msra.mxu0 %v1379_v7  ;;  %1412 = vmatpush3.bf16.msra.mxu1 %v1411_v8 }
 0x17a   : > { %1382 = vmatprep.subr.bf16.mxu0 %v1381_v11  ;;  %1414 = vmatprep.subr.bf16.mxu1 %v1413_v12 }
 0x17d   : > { %1384 = vmatpush3.bf16.msra.mxu0 %v1383_v21  ;;  %1416 = vmatpush3.bf16.msra.mxu1 %v1415_v22 }
 0x17e   : > { %1386 = vmatprep.subr.bf16.mxu0 %v1385_v24  ;;  %1418 = vmatprep.subr.bf16.mxu1 %v1417_v25 }
 0x181   : > { %1388 = vmatpush3.bf16.msra.mxu0 %v1387_v29  ;;  %1420 = vmatpush3.bf16.msra.mxu1 %v1419_v30 }
 0x184   : > { %922 = vmatmul.mubr.f32.vlgmr.msra.gmra.mrb[6].mxu0 %v585_v32  ;;  %992 = vmatmul.mubr.f32.vlgmr.msra.gmra.mrb[6].mxu1 %v587_v31 }
 0x237   : > { %v1185_v33 = vpop.f32.mrb[4].mxu0  ;;  %v1220_v34 = vpop.f32.mrb[4].mxu1 }
 0x238   : > { %v1186_v35 = vpop.f32.mrb[5].mxu0  ;;  %v1221_v36 = vpop.f32.mrb[5].mxu1 }
 0x239   : > { %v1187_v37 = vadd.f32 %v1186_v35, %v1185_v33  ;;  %v1222_v38 = vadd.f32 %v1221_v36, %v1220_v34 }
 0x23b   : > { %v854_v39 = vadd.f32 %v1222_v38, %v1187_v37 }
 0x257   : > { %v1255_v40 = vpop.f32.mrb[6].mxu0  ;;  %v1290_v41 = vpop.f32.mrb[6].mxu1 }
 0x258   : > { %v1256_v42 = vpop.f32.mrb[7].mxu0  ;;  %v1291_v43 = vpop.f32.mrb[7].mxu1 }
 0x259   : > { %v1257_v44 = vadd.f32 %v1256_v42, %v1255_v40  ;;  %v1292_v17 = vadd.f32 %v1291_v43, %v1290_v41 }
 0x25b   : > { %v924_v45 = vadd.f32 %v1257_v44, %v854_v39 }
 0x25d   : > { %v994_v46 = vadd.f32 %v1292_v17, %v924_v45 }
 0x25f   : > { %997 = vst [vmem:[#allocation5] sm:$0xff] %v994_v46 }
 0x260 LB: >> { %s1004_s28 = sadd.s32 %s1732_s21, %s1142_s14  ;;  %s1008_s16 = scalar_lea.vmem [#allocation5], %s1732_s21  ;;  %s1732_s21 = sphi %s1730_s21, %s1003_s21  }
 0x261   : >> { %s1005_s22 = sld [smem:[#allocation8 + %s1004_s28]]  ;;  %s1003_s21 = sadd.s32 1, %s1732_s21  }
 0x262   : >> { %p1000_p4 = scmp.ge.s32.totalorder %s1003_s21, 8  }
 0x263   : > { %p1012_p10 = scmp.eq.s32.totalorder (%p1000_p4), %s1708_s8, 1  ;;  %p1147_p12 = scmp.ne.s32.totalorder (%p1000_p4), %s1708_s8, 1 }
 0x265   : > { %1002 = sbr.rel (!%p1000_p4) target bundleno = 608 (0x260), region = 125 }
 0x266   : >> { %v1009_v51 = vld [vmem:[%s1008_s16] sm:$0x1] }
 0x267   : >> { %s1006_s20 = scalar_lea.vmem [#allocation3], %s1005_s22 }
 0x268   : >> { %v1007_v16 = vld [vmem:[%s1006_s20] sm:$0x1] }
 0x269   : >> { %v1010_v47 = vadd.f32 %v1009_v51, %v1007_v16 }
 0x26b   : >> { %1011 = vst [vmem:[%s1006_s20] sm:$0x1] %v1010_v47 }
 0x26c   : > { %1015 = sbr.rel (%p1147_p12) target bundleno = 628 (0x274), region = 70 }
 0x272   : > { %v1016_v48 = vld [vmem:[#allocation3] sm:$0xff] (!%p1147_p12) }
 0x273   : > { %1017 = vst [vmem:[#allocation2] sm:$0xff] %v1016_v48 }
 0x274 PF: > { %p1018_p1 = scmp.eq.s32.totalorder %s1712_s9, 1 }
 0x276   : > { %p1019_p0 = pnand %p1018_p1, %p1012_p10 }
 0x277   : > { %v1023_v49 = vld [vmem:[#allocation3] sm:$0xff] (!%p1019_p0) }
 0x278   : > { %1022 = sbr.rel (%p1019_p0) target bundleno = 639 (0x27f), region = 74  ;;  %1024 = vst [vmem:[#allocation14] sm:$0xff] (!%p1019_p0), %v1023_v49 }
 0x27f PF: > { %s2190_s25 = sadd.s32 4294967295, %s1724_s12   ;;  %s1742_s15 = smov [#allocation14]  }
 0x280   : > { %p2117_p8 = scmp.eq.s32.totalorder %s2190_s25, 3  ;;  %s1032_s8 = sshll.u32 %s1742_s15, 4  ;;  %s1033_s8 = int_to_ptr.vmem [resolvable:$true] %s1032_s8 }
 0x281   : > { %s1614_s27 = scalar_lea.vmem %s1033_s8, 128  ;;  %p1621_p3 = scmp.lt.s32.totalorder %s1033_s8, %s1033_s8 }
 0x282   : > { %p1615_p11 = scmp.ne.s32.totalorder %s1033_s8, %s1614_s27  ;;  %p1622_p5 = scmp.lt.s32.totalorder %s1614_s27, %s1614_s27 }
 0x284   : > { %p1616_p7 = pnand %p1615_p11, %p2117_p8  ;;  %p1623_p6 = por %p1622_p5, %p1621_p3 }
 0x286   : > { %p1617_p2 = pneg %p1616_p7 }
 0x288   : > { %p1624_p9 = pnand %p1623_p6, %p1617_p2 }
 0x28a   : > { %1627 = shalt.err (!%p1624_p9)
}
 0x28b   : > { %s1628_s14 = scalar_lea.hbm %s2172_s6, 128 }
 0x28c   : > { %p1629_p13 = scmp.ne.s32.totalorder %s2172_s6, %s1628_s14  ;;  %p1634_p12 = scmp.lt.u32.totalorder %s1628_s14, %s2172_s6 }
 0x28e   : > { %p1630_p4 = pnand %p1629_p13, %p2117_p8 }
 0x290   : > { %p1631_p10 = pneg %p1630_p4 }
 0x292   : > { %p1636_p1 = pnand %p1634_p12, %p1631_p10 }
 0x294   : > { %1639 = shalt.err (!%p1636_p1)
}
 0x295   : > { %1428 = dma.vmem_to_hbm [thread:$0]  (%p2117_p8), %s1033_s8, 128, %s2172_s6, [#allocation11]  }
 0x296   : > { %1691 = dma.done.wait (%p2117_p8), [#allocation11], 128  }
 0x297   : > { %1693 = vsyncadd (%p2117_p8), [#allocation11], 4294967168 }
 0x298 PF: > { %s31_s12 = sadd.s32 1, %s1724_s12   ;;  %s2192_s28 = smov %s2201_s1 }
 0x299   : > { %p28_p0 = scmp.ge.s32.totalorder %s31_s12, 6   ;;  %s2193_s1 = smov %s1700_s30 }
 0x29a   : > { %s2194_s30 = smov %s1704_s7  ;;  %s2195_s7 = smov %s1930_s24 }
 0x29b   : > { %s2196_s8 = smov %s1716_s10  ;;  %s2197_s9 = smov %s1720_s11 }
 0x29c   : > { %s2198_s10 = smov %s2192_s28  ;;  %s2199_s11 = smov %s2205_s17 }
 0x29d   :  { %30 = sbr.rel (!%p28_p0) target bundleno = 32 (0x20), region = 136 }
 0x2a4   :  { %1045 = vsyncpa [#allocation10], 1 }
 0x2a5   :  { %1047 = vsyncpa [#allocation10 + $0x1], 1 }
 0x2a6   :  { %1048 = vsyncpa [#allocation13], 1 }
 0x2a7   :  { %1049 = vsyncpa [#allocation11], 1 }
 0x2a8   :  { %1051 = vsyncpa [#allocation11 + $0x1], 1 }

</bundles_post_ra>
